<compile_context>
chip_gen: v7x
topology: tpu7x:2x2x1
jax: 0.10.0
libtpu: 0.0.40
codegen_flags: <defaults>
</compile_context>

<pallas_src>
import functools

import jax
import jax.numpy as jnp
from jax import lax
from jax.experimental import pallas as pl
from jax.experimental.pallas import tpu as pltpu

LANE = 128
SUBLANE = 8


def _round_up(n: int, m: int) -> int:
    return ((n + m - 1) // m) * m


def _round_down(n: int, m: int) -> int:
    return (n // m) * m


# --------------------------------------------------------------------------------------
# Kernels
# --------------------------------------------------------------------------------------
def _bridge_rowmajor_kernel(x_ref, w1_ref, b1_ref, w2_ref, b2_ref, out_ref, *, row_chunk):
    # x_ref:  [TB, 6]  (batch on sublanes)   w1_ref: [6, 32]   b1_ref: [1, 32] (f32)
    # w2_ref: [32, 4]                         b2_ref: [1, 4]  (f32)   out_ref: [TB, 4]
    w1 = w1_ref[...]
    b1 = b1_ref[...].astype(jnp.float32)
    w2 = w2_ref[...]
    b2 = b2_ref[...].astype(jnp.float32)
    n_chunks = out_ref.shape[0] // row_chunk  # tb is a multiple of row_chunk by construction

    def body(c, carry):
        r0 = pl.multiple_of(c * row_chunk, row_chunk)
        rows = pl.ds(r0, row_chunk)
        x = x_ref[rows, :]
        # Layer 1: Linear(6 -> 32) + ReLU (MXU, f32 accumulate)
        h = jnp.dot(x, w1, preferred_element_type=jnp.float32)
        h = jnp.maximum(h + b1, 0.0)
        # Layer 2: Linear(32 -> 4)
        y = jnp.dot(h.astype(w2.dtype), w2, preferred_element_type=jnp.float32)
        out_ref[rows, :] = (y + b2).astype(out_ref.dtype)
        return carry

    lax.fori_loop(0, n_chunks, body, 0)


def _bridge_featmajor_kernel(x_ref, w1_ref, b1_ref, w2_ref, b2_ref, out_ref, *, lane_chunk):
    # Feature-major (lane-dense) formulation: batch lives on lanes.
    # x_ref:  [6, TB]    w1_ref: [32, 6] (PyTorch [out,in])   b1_ref: [32, 1] (f32)
    # w2_ref: [4, 32]    b2_ref: [4, 1]  (f32)                 out_ref: [4, TB]
    w1 = w1_ref[...]
    b1 = b1_ref[...].astype(jnp.float32)
    w2 = w2_ref[...]
    b2 = b2_ref[...].astype(jnp.float32)
    n_chunks = out_ref.shape[1] // lane_chunk  # tb is a multiple of lane_chunk by construction

    def body(c, carry):
        l0 = pl.multiple_of(c * lane_chunk, lane_chunk)
        cols = pl.ds(l0, lane_chunk)
        x = x_ref[:, cols]
        h = jnp.dot(w1, x, preferred_element_type=jnp.float32)      # [32, chunk]
        h = jnp.maximum(h + b1, 0.0)
        y = jnp.dot(w2, h.astype(w2.dtype), preferred_element_type=jnp.float32)  # [4, chunk]
        out_ref[:, cols] = (y + b2).astype(out_ref.dtype)
        return carry

    lax.fori_loop(0, n_chunks, body, 0)


# --------------------------------------------------------------------------------------
# Wrappers
# --------------------------------------------------------------------------------------
def bridge_nn_forward(x, w1_oi, b1, w2_oi, b2, *, tile_b=None, vmem_budget_bytes=24 << 20):
    """x: [B, 6] -> [B, 4].  Weights in PyTorch layout: w1_oi [32,6], b1 [32], w2_oi [4,32], b2 [4].

    Compute dtype follows x.dtype (pass bf16 x for half HBM read/write traffic); MXU
    accumulation is always f32.  Non-divisible B is handled with Pallas partial boundary
    blocks (no jnp.pad copy of x).
    """
    B, f_in = x.shape
    f_hid = w1_oi.shape[0]
    f_out = w2_oi.shape[0]
    cdt = x.dtype
    out_dtype = x.dtype

    # Tiny (<2 KB) parameter reshapes/casts: negligible traffic, constant-folded under jit.
    w1 = w1_oi.T.astype(cdt)                       # [6, 32]
    w2 = w2_oi.T.astype(cdt)                       # [32, 4]
    b1r = b1.reshape(1, f_hid).astype(jnp.float32)
    b2r = b2.reshape(1, f_out).astype(jnp.float32)

    x_is = jnp.dtype(cdt).itemsize
    o_is = jnp.dtype(out_dtype).itemsize
    sl_align = SUBLANE * max(1, 4 // x_is)         # 8 for f32, 16 for bf16 (packed sublanes)

    # --- batch tile from the *padded* VMEM footprint (lane dim padded to 128) ---
    row_chunk = 512
    per_row = 2 * LANE * x_is + 2 * LANE * o_is    # x + out blocks, double-buffered, lane-padded
    const = (2 * row_chunk * LANE * 4              # h / y chunk intermediates (f32, lane-padded)
             + 2 * (SUBLANE * LANE * x_is + SUBLANE * LANE * 4
                    + _round_up(f_hid, SUBLANE) * LANE * x_is + SUBLANE * LANE * 4))  # weights
    budget = max(int(vmem_budget_bytes) - const, 1 << 20)
    tb_vmem = max(budget // per_row, sl_align)

    if tile_b is None:
        tb = min(tb_vmem, 32768)
        # Keep >= ~8 grid steps for large batches (v7x: two TCs share the "parallel" axis).
        tb = min(tb, max(1024, _round_up(pl.cdiv(B, 8), sl_align)))
    else:
        tb = max(int(tile_b), sl_align)
    tb = min(tb, _round_up(B, sl_align))
    if tb >= row_chunk:
        tb = _round_down(tb, row_chunk)
        chunk = row_chunk
    else:
        tb = _round_up(tb, sl_align)
        chunk = tb
    num_tiles = pl.cdiv(B, tb)

    vmem_need = 2 * tb * LANE * x_is + 2 * tb * LANE * o_is + const
    vmem_limit = max(4 << 20, int(vmem_need) + (4 << 20))

    cost = pl.CostEstimate(
        flops=2 * B * (f_in * f_hid + f_hid * f_out),
        transcendentals=0,
        bytes_accessed=int(B * (f_in * x_is + f_out * o_is)
                           + (w1.size + w2.size) * x_is + 4 * (b1r.size + b2r.size)),
    )

    kernel = functools.partial(_bridge_rowmajor_kernel, row_chunk=chunk)
    return pl.pallas_call(
        kernel,
        out_shape=jax.ShapeDtypeStruct((B, f_out), out_dtype),
        grid=(num_tiles,),
        in_specs=[
            pl.BlockSpec((tb, f_in), lambda i: (i, 0)),       # x: tiled over batch (partial tail OK)
            pl.BlockSpec((f_in, f_hid), lambda i: (0, 0)),    # W1: resident
            pl.BlockSpec((1, f_hid), lambda i: (0, 0)),       # b1: resident
            pl.BlockSpec((f_hid, f_out), lambda i: (0, 0)),   # W2: resident
            pl.BlockSpec((1, f_out), lambda i: (0, 0)),       # b2: resident
        ],
        out_specs=pl.BlockSpec((tb, f_out), lambda i: (i, 0)),
        compiler_params=pltpu.CompilerParams(
            dimension_semantics=("parallel",),
            vmem_limit_bytes=vmem_limit,
        ),
        cost_estimate=cost,
    )(x, w1, b1r, w2, b2r)


def bridge_nn_forward_feature_major(x_fm, w1_oi, b1, w2_oi, b2, *, tile_b=None,
                                    vmem_budget_bytes=24 << 20):
    """Lane-dense fast path.  x_fm: [6, B] (feature-major) -> [4, B] (feature-major).

    Same math as bridge_nn_forward; intended for callers whose producer can emit x
    feature-major (no extra HBM transpose pass is added here).
    """
    f_in, B = x_fm.shape
    f_hid = w1_oi.shape[0]
    f_out = w2_oi.shape[0]
    cdt = x_fm.dtype
    out_dtype = x_fm.dtype

    w1 = w1_oi.astype(cdt)                         # [32, 6]  PyTorch native [out, in]
    w2 = w2_oi.astype(cdt)                         # [4, 32]
    b1c = b1.reshape(f_hid, 1).astype(jnp.float32)
    b2c = b2.reshape(f_out, 1).astype(jnp.float32)

    x_is = jnp.dtype(cdt).itemsize
    o_is = jnp.dtype(out_dtype).itemsize

    lane_chunk = 1024
    per_col = 2 * SUBLANE * x_is + 2 * SUBLANE * o_is   # x + out blocks, double-buffered, sublane-padded
    const = (2 * lane_chunk * _round_up(f_hid, SUBLANE) * 4          # h / y chunk intermediates
             + 2 * (_round_up(f_hid, SUBLANE) * LANE * (x_is + 4)
                    + SUBLANE * LANE * (x_is + 4)))                  # weights + biases
    budget = max(int(vmem_budget_bytes) - const, 1 << 20)
    tb_vmem = max(budget // per_col, LANE)

    if tile_b is None:
        tb = min(tb_vmem, 131072)
        tb = min(tb, max(8192, _round_up(pl.cdiv(B, 8), LANE)))      # >= ~8 tiles when B is large
    else:
        tb = max(int(tile_b), LANE)
    tb = min(tb, _round_up(B, LANE))
    if tb >= lane_chunk:
        tb = _round_down(tb, lane_chunk)
        chunk = lane_chunk
    else:
        tb = _round_up(tb, LANE)
        chunk = tb
    num_tiles = pl.cdiv(B, tb)

    vmem_need = 2 * SUBLANE * tb * x_is + 2 * SUBLANE * tb * o_is + const
    vmem_limit = max(4 << 20, int(vmem_need) + (4 << 20))

    cost = pl.CostEstimate(
        flops=2 * B * (f_in * f_hid + f_hid * f_out),
        transcendentals=0,
        bytes_accessed=int(B * (f_in * x_is + f_out * o_is)
                           + (w1.size + w2.size) * x_is + 4 * (b1c.size + b2c.size)),
    )

    kernel = functools.partial(_bridge_featmajor_kernel, lane_chunk=chunk)
    return pl.pallas_call(
        kernel,
        out_shape=jax.ShapeDtypeStruct((f_out, B), out_dtype),
        grid=(num_tiles,),
        in_specs=[
            pl.BlockSpec((f_in, tb), lambda i: (0, i)),       # x^T: batch on lanes (dense DMA)
            pl.BlockSpec((f_hid, f_in), lambda i: (0, 0)),    # W1: resident
            pl.BlockSpec((f_hid, 1), lambda i: (0, 0)),       # b1: resident
            pl.BlockSpec((f_out, f_hid), lambda i: (0, 0)),   # W2: resident
            pl.BlockSpec((f_out, 1), lambda i: (0, 0)),       # b2: resident
        ],
        out_specs=pl.BlockSpec((f_out, tb), lambda i: (0, i)),
        compiler_params=pltpu.CompilerParams(
            dimension_semantics=("parallel",),
            vmem_limit_bytes=vmem_limit,
        ),
        cost_estimate=cost,
    )(x_fm, w1, b1c, w2, b2c)


# --------------------------------------------------------------------------------------
# Params (PyTorch nn.Linear default init, stored in PyTorch [out, in] layout)
# --------------------------------------------------------------------------------------
def init_params(key):
    k1, k2, k3, k4 = jax.random.split(key, 4)
    bound1 = 1.0 / jnp.sqrt(6.0)
    bound2 = 1.0 / jnp.sqrt(32.0)
    w1_oi = jax.random.uniform(k1, (32, 6), jnp.float32, -bound1, bound1)
    b1 = jax.random.uniform(k2, (32,), jnp.float32, -bound1, bound1)
    w2_oi = jax.random.uniform(k3, (4, 32), jnp.float32, -bound2, bound2)
    b2 = jax.random.uniform(k4, (4,), jnp.float32, -bound2, bound2)
    return w1_oi, b1, w2_oi, b2


if __name__ == "__main__":
    key = jax.random.PRNGKey(0)
    kp, kx1, kx2, kx3, kx4 = jax.random.split(key, 5)
    w1_oi, b1, w2_oi, b2 = init_params(kp)

    def ref_forward(x):
        h = jnp.maximum(x @ w1_oi.T + b1, 0.0)
        return h @ w2_oi.T + b2

    # 1) Small batch, exact PyTorch [B, 6] -> [B, 4] contract.
    x1 = jax.random.normal(kx1, (8, 6), jnp.float32)
    out1 = jax.block_until_ready(bridge_nn_forward(x1, w1_oi, b1, w2_oi, b2))
    assert out1.shape == (8, 4)
    assert jnp.allclose(out1, ref_forward(x1), atol=5e-2, rtol=5e-2)

    # 2) Non-divisible batch, multiple grid steps, partial boundary block (no jnp.pad pass).
    x2 = jax.random.normal(kx2, (1000, 6), jnp.float32)
    out2 = jax.block_until_ready(bridge_nn_forward(x2, w1_oi, b1, w2_oi, b2, tile_b=512))
    assert out2.shape == (1000, 4)
    assert jnp.allclose(out2, ref_forward(x2), atol=5e-2, rtol=5e-2)

    # 3) Caller-supplied bf16 activations (no wrapper-side cast pass; f32 MXU accumulate).
    x3 = jax.random.normal(kx3, (256, 6), jnp.float32)
    out3 = jax.block_until_ready(
        bridge_nn_forward(x3.astype(jnp.bfloat16), w1_oi, b1, w2_oi, b2))
    assert out3.shape == (256, 4) and out3.dtype == jnp.bfloat16
    assert jnp.allclose(out3.astype(jnp.float32), ref_forward(x3), atol=2e-1, rtol=2e-1)

    # 4) Feature-major (lane-dense) fast path: x as [6, B], output as [4, B].
    x4 = jax.random.normal(kx4, (256, 6), jnp.float32)
    out4 = jax.block_until_ready(
        bridge_nn_forward_feature_major(x4.T, w1_oi, b1, w2_oi, b2))
    assert out4.shape == (4, 256)
    assert jnp.allclose(out4.T, ref_forward(x4), atol=5e-2, rtol=5e-2)

    print("KERNEL_OK")
</pallas_src>

<mosaic_0001>
module attributes {stable_mosaic.version = 11 : i64} {
  func.func @_bridge_rowmajor_kernel(%arg0: i32, %arg1: memref<8x6xf32, #tpu.memory_space<vmem>>, %arg2: memref<6x32xf32, #tpu.memory_space<vmem>>, %arg3: memref<1x32xf32, #tpu.memory_space<vmem>>, %arg4: memref<32x4xf32, #tpu.memory_space<vmem>>, %arg5: memref<1x4xf32, #tpu.memory_space<vmem>>, %arg6: memref<8x4xf32, #tpu.memory_space<vmem>>) attributes {dimension_semantics = [#tpu.dimension_semantics<parallel>], iteration_bounds = array<i64: 1>, scalar_prefetch = 0 : i64, scratch_operands = 0 : i64, tpu.core_type = #tpu.core_type<tc>, window_params = [{transform_indices = @transform_0, window_bounds = array<i64: 8, 6>}, {pipeline_mode = #tpu.pipeline_mode<synchronous>, transform_indices = @transform_1, window_bounds = array<i64: 6, 32>}, {pipeline_mode = #tpu.pipeline_mode<synchronous>, transform_indices = @transform_2, window_bounds = array<i64: 1, 32>}, {pipeline_mode = #tpu.pipeline_mode<synchronous>, transform_indices = @transform_3, window_bounds = array<i64: 32, 4>}, {pipeline_mode = #tpu.pipeline_mode<synchronous>, transform_indices = @transform_4, window_bounds = array<i64: 1, 4>}, {transform_indices = @transform_5, window_bounds = array<i64: 8, 4>}]} {
    %c0 = arith.constant 0 : index
    %c0_0 = arith.constant 0 : index
    %0 = vector.load %arg2[%c0, %c0_0] : memref<6x32xf32, #tpu.memory_space<vmem>>, vector<6x32xf32>
    %c0_1 = arith.constant 0 : index
    %c0_2 = arith.constant 0 : index
    %1 = vector.load %arg3[%c0_1, %c0_2] : memref<1x32xf32, #tpu.memory_space<vmem>>, vector<1x32xf32>
    %c0_3 = arith.constant 0 : index
    %c0_4 = arith.constant 0 : index
    %2 = vector.load %arg4[%c0_3, %c0_4] : memref<32x4xf32, #tpu.memory_space<vmem>>, vector<32x4xf32>
    %c0_5 = arith.constant 0 : index
    %c0_6 = arith.constant 0 : index
    %3 = vector.load %arg5[%c0_5, %c0_6] : memref<1x4xf32, #tpu.memory_space<vmem>>, vector<1x4xf32>
    %c0_i32 = arith.constant 0 : i32
    %c8_i32 = arith.constant 8 : i32
    %4 = arith.muli %c0_i32, %c8_i32 : i32
    %5 = tpu.assume_multiple %4, 8 : i32
    %6 = arith.index_cast %5 : i32 to index
    %c0_7 = arith.constant 0 : index
    %7 = vector.load %arg1[%6, %c0_7] : memref<8x6xf32, #tpu.memory_space<vmem>>, vector<8x6xf32>
    %cst = arith.constant dense<0.000000e+00> : vector<8x32xf32>
    %8 = tpu.matmul %7, %0, %cst {dimension_numbers = #tpu.dot_dimension_numbers<[1], [0], [0], [1], [0, 0, 1, 1], [], []>} : vector<8x6xf32>, vector<6x32xf32>, vector<8x32xf32> -> vector<8x32xf32>
    %9 = vector.broadcast %1 : vector<1x32xf32> to vector<8x32xf32>
    %10 = arith.addf %8, %9 : vector<8x32xf32>
    %cst_8 = arith.constant 0.000000e+00 : f32
    %11 = vector.broadcast %cst_8 : f32 to vector<8x32xf32>
    %12 = arith.maximumf %10, %11 : vector<8x32xf32>
    %cst_9 = arith.constant dense<0.000000e+00> : vector<8x4xf32>
    %13 = tpu.matmul %12, %2, %cst_9 {dimension_numbers = #tpu.dot_dimension_numbers<[1], [0], [0], [1], [0, 0, 1, 1], [], []>} : vector<8x32xf32>, vector<32x4xf32>, vector<8x4xf32> -> vector<8x4xf32>
    %14 = vector.broadcast %3 : vector<1x4xf32> to vector<8x4xf32>
    %15 = arith.addf %13, %14 : vector<8x4xf32>
    %16 = arith.index_cast %5 : i32 to index
    %c0_10 = arith.constant 0 : index
    %17 = vector.load %arg6[%16, %c0_10] : memref<8x4xf32, #tpu.memory_space<vmem>>, vector<8x4xf32>
    tpu.vector_store %arg6[%16, %c0_10], %15 {strides = array<i32>} : memref<8x4xf32, #tpu.memory_space<vmem>>, vector<8x4xf32>,
    %c1_i32 = arith.constant 1 : i32
    return
  }
  func.func @transform_0(%arg0: i32) -> (i32, i32) {
    %c0_i32 = arith.constant 0 : i32
    %c0_i32_0 = arith.constant 0 : i32
    return %arg0, %c0_i32 : i32, i32
  }
  func.func @transform_1(%arg0: i32) -> (i32, i32) {
    %c0_i32 = arith.constant 0 : i32
    %c0_i32_0 = arith.constant 0 : i32
    %c0_i32_1 = arith.constant 0 : i32
    return %c0_i32, %c0_i32_0 : i32, i32
  }
  func.func @transform_2(%arg0: i32) -> (i32, i32) {
    %c0_i32 = arith.constant 0 : i32
    %c0_i32_0 = arith.constant 0 : i32
    %c0_i32_1 = arith.constant 0 : i32
    return %c0_i32, %c0_i32_0 : i32, i32
  }
  func.func @transform_3(%arg0: i32) -> (i32, i32) {
    %c0_i32 = arith.constant 0 : i32
    %c0_i32_0 = arith.constant 0 : i32
    %c0_i32_1 = arith.constant 0 : i32
    return %c0_i32, %c0_i32_0 : i32, i32
  }
  func.func @transform_4(%arg0: i32) -> (i32, i32) {
    %c0_i32 = arith.constant 0 : i32
    %c0_i32_0 = arith.constant 0 : i32
    %c0_i32_1 = arith.constant 0 : i32
    return %c0_i32, %c0_i32_0 : i32, i32
  }
  func.func @transform_5(%arg0: i32) -> (i32, i32) {
    %c0_i32 = arith.constant 0 : i32
    %c0_i32_0 = arith.constant 0 : i32
    return %arg0, %c0_i32 : i32, i32
  }
}

</mosaic_0001>

<bundles_post_ra>
// kernel: tpu_custom_call.1
= control target key start
LH: loop header
LB: loop body
LE: loop exit
PB: predicated region body
PF: predicated region fallthrough
CT: control target
= control target key end

     0   :  { %vm38_vm0 = vcmask 1045504   ;;  %vm34_vm1 = vcmask 48128   ;;  %v236_v0 = vmov 0.0   ;;  %vm237_vm2 = vmmov 0   ;;  %s296_s1 = inlined_call_operand.vmem [shape: f32[6,32], index: 1, kind: input, shape index: {}]   ;;  %s297_s0 = inlined_call_operand.vmem [shape: f32[8,6], index: 0, kind: input, shape index: {}]   ;;  %s298_s3 = inlined_call_operand.vmem [shape: f32[32,4], index: 3, kind: input, shape index: {}]   ;;  %s299_s2 = inlined_call_operand.vmem [shape: f32[1,32], index: 2, kind: input, shape index: {}]   ;;  %s300_s4 = inlined_call_operand.vmem [shape: f32[1,4], index: 4, kind: input, shape index: {}]   ;;  %s301_s5 = inlined_call_operand.vmem [shape: f32[8,4], index: 5, kind: output, shape index: {}]  }
   0x1   :  { %211 = vmatprep.subr.mxu0 %v236_v0  ;;  %v20_v1 = vld [vmem:[%s296_s1] sm:$0x3f]  ;;  %213 = vmatprep.mubr.msk.f32.mxu0 %vm237_vm2, %v236_v0  ;;  %v238_v4 = vmov 0.0|0.0   ;;  %v23_v5 = vld [vmem:[%s298_s3 + $0x8] sm:$0xff]  ;;  %v24_v7 = vld [vmem:[%s298_s3 + $0x10] sm:$0xff]  ;;  %vm119_vm3 = vcmask 261120  }
   0x2   :  { %v27_v2 = vld [vmem:[%s297_s0] sm:$0xff]  ;;  %212 = vmatpush3.msk.msra.mxu0 %vm38_vm0, %v20_v1  ;;  %227 = vmatprep.subr.bf16.mxu1 %v238_v4  ;;  %v25_v8 = vld [vmem:[%s298_s3 + $0x18] sm:$0xff]  ;;  %vm193_vm4 = vcmask 31744  }
   0x3   :  { %v22_v3 = vld [vmem:[%s298_s3] sm:$0xff]  ;;  %214 = vmatmul.mubr.msk.f32.vlgmr.msra.gmra.mrb[0].mxu0 %vm34_vm1, %v27_v2  ;;  %224 = vmatprep.mubr.msk.f32.mxu1 %vm237_vm2, %v236_v0  ;;  %v231_v9 = vpack.c.bf16 %v25_v8, %v24_v7 }
   0x4   :  { %v228_v6 = vpack.c.bf16 %v23_v5, %v22_v3  ;;  %v199_v10 = vld [vmem:[%s299_s2] ss:$0 sm:$0xff] }
   0x5   :  { %v202_v15 = vld [vmem:[%s300_s4] ss:$0 sm:$0xff] }
   0x6   :  { %229 = vmatpush3.bf16.msra.mxu1 %v228_v6 }
   0x7   :  { %230 = vmatprep.subr.bf16.mxu1 %v238_v4 }
   0xa   :  { %232 = vmatpush3.bf16.msra.mxu1 %v231_v9 }
  0xd6   :  { %v108_v11 = vpop.f32.mrb[0].mxu0 }
  0xd7   :  { %v109_v12 = vadd.f32 %v199_v10, %v108_v11  ;;  %v215_v13 = vpop.f32.mrb[1].mxu0 }
  0xd9   :  { %v112_v14 = vmax.f32 %v109_v12, 0.0 }
  0xdb   :  { %225 = vmatmul.mubr.msk.f32.vlgmr.msra.gmra.mrb[0].mxu1 %vm119_vm3, %v112_v14 }
 0x1ae   :  { %v189_v16 = vpop.f32.mrb[0].mxu1 }
 0x1af   :  { %v190_v17 = vadd.f32 %v202_v15, %v189_v16  ;;  %v226_v18 = vpop.f32.mrb[1].mxu1 }
 0x1b1   :  { %194 = vst.msk [vmem:[%s301_s5] sm:$0xff] %vm193_vm4, %v190_v17 }

</bundles_post_ra>
